<compile_context>
chip_gen: v7x
topology: tpu7x:2x2x1
jax: 0.10.0
libtpu: 0.0.40
codegen_flags: <defaults>
</compile_context>

<pallas_src>
import jax
import jax.numpy as jnp
from jax.experimental import pallas as pl
from jax.experimental.pallas import tpu as pltpu


# ---------------------------------------------------------------------------
# Kernels
# ---------------------------------------------------------------------------

def _linear_kernel_whole_k(x_ref, w_ref, b_ref, o_ref):
    # x_ref: (tm, K), w_ref: (K, tn), b_ref: (1, tn) f32, o_ref: (tm, tn)
    acc = jnp.dot(x_ref[...], w_ref[...], preferred_element_type=jnp.float32)
    o_ref[...] = (acc + b_ref[...]).astype(o_ref.dtype)


def _linear_kernel_tiled_k(x_ref, w_ref, b_ref, o_ref, acc_ref):
    # x_ref: (tm, tk), w_ref: (tk, tn), b_ref: (1, tn) f32,
    # o_ref: (tm, tn), acc_ref: (tm, tn) f32 VMEM scratch
    k = pl.program_id(2)

    @pl.when(k == 0)
    def _():
        acc_ref[...] = jnp.zeros_like(acc_ref)

    acc_ref[...] += jnp.dot(x_ref[...], w_ref[...],
                            preferred_element_type=jnp.float32)

    @pl.when(k == pl.num_programs(2) - 1)
    def _():
        o_ref[...] = (acc_ref[...] + b_ref[...]).astype(o_ref.dtype)


# ---------------------------------------------------------------------------
# Helpers
# ---------------------------------------------------------------------------

def _round_up(a: int, b: int) -> int:
    return ((a + b - 1) // b) * b


def _default_tm() -> int:
    # Roofline ridge (flops/byte of weight stream) differs per generation:
    #   v5e ~240, v7x ~310, v6e ~650-700  ->  tm near the knee, no larger.
    try:
        kind = jax.devices()[0].device_kind.lower()
    except Exception:
        return 512
    if "v6" in kind:
        return 1024
    if "v5" in kind:
        return 256
    return 512


def _choose_tk(K: int) -> int:
    if K <= 1024:
        return K
    for cand in (1024, 512, 256, 128):
        if K % cand == 0:
            return cand
    # TODO(synk): rare non-128-multiple large d_model -> whole-K tiles (more VMEM).
    return K


def _vmem_bytes(tm: int, tn: int, tk: int, in_bytes: int, out_bytes: int) -> int:
    return (2 * (tm * tk + tk * tn) * in_bytes   # double-buffered x / w tiles
            + 2 * tm * tn * out_bytes            # double-buffered output tile
            + tm * tn * 4                        # f32 accumulator scratch
            + 2 * tn * 4)                        # bias tile


def prepare_codebook_params(weight, bias, compute_dtype=jnp.bfloat16):
    """One-time prep of nn.Linear params (PyTorch layout).

    weight: (vocab_size, d_model) -> (d_model, vocab_size) in compute_dtype
    bias:   (vocab_size,)         -> (1, vocab_size) float32

    Do this once at init so there is no per-forward weight cast / transpose /
    extra HBM copy. Pass compute_dtype=jnp.float32 for full-precision matmul
    (doubles weight DMA / VMEM).
    """
    w_t = jnp.asarray(weight).T.astype(compute_dtype)
    b2d = jnp.asarray(bias).astype(jnp.float32).reshape(1, -1)
    return w_t, b2d


# ---------------------------------------------------------------------------
# Forward
# ---------------------------------------------------------------------------

def codebook_reconstruction_forward(x, w_t, b2d, *, tm=None, tn=512,
                                    out_dtype=jnp.float32,
                                    vmem_budget_bytes=14 * 1024 * 1024):
    """y = x @ W^T + b with (w_t, b2d) from prepare_codebook_params.

    x:   (..., d_model)      any float dtype (cast to w_t.dtype for the MXU)
    w_t: (d_model, vocab)    compute dtype (bf16 recommended; f32 supported)
    b2d: (1, vocab)          float32
    """
    d_model, vocab = w_t.shape
    assert x.shape[-1] == d_model, "x last dim must equal d_model"
    lead_shape = x.shape[:-1]

    compute_dtype = w_t.dtype
    x2d = x.reshape(-1, d_model).astype(compute_dtype)
    M = x2d.shape[0]

    in_bytes = jnp.dtype(compute_dtype).itemsize
    out_bytes = jnp.dtype(out_dtype).itemsize

    if tm is None:
        tm = _default_tm()
    tk = _choose_tk(d_model)

    # Clamp tiles to the (hardware-granularity-rounded) problem size.
    tm_eff = min(tm, _round_up(max(M, 1), 16))
    tn_eff = min(tn, _round_up(vocab, 128))

    # Keep the double-buffered working set inside every generation's default
    # scoped VMEM (16 MiB v5e, 32 MiB v6e/v7x) -> no vmem_limit_bytes override.
    while (_vmem_bytes(tm_eff, tn_eff, tk, in_bytes, out_bytes) > vmem_budget_bytes
           and tm_eff > 64):
        tm_eff = max(64, _round_up(tm_eff // 2, 8))
    while (_vmem_bytes(tm_eff, tn_eff, tk, in_bytes, out_bytes) > vmem_budget_bytes
           and tn_eff > 128):
        tn_eff = max(128, _round_up(tn_eff // 2, 128))

    grid_m = pl.cdiv(M, tm_eff)
    grid_n = pl.cdiv(vocab, tn_eff)
    grid_k = d_model // tk  # exact: tk | d_model or tk == d_model

    # Real HBM traffic: weight re-streamed once per M tile, x once per vocab tile.
    cost = pl.CostEstimate(
        flops=2 * M * d_model * vocab,
        transcendentals=0,
        bytes_accessed=(
            grid_n * M * d_model * in_bytes      # activations (re-read per vocab tile)
            + grid_m * vocab * d_model * in_bytes  # weight (re-read per M tile)
            + vocab * 4                            # bias
            + M * vocab * out_bytes                # output write
        ),
    )

    # TODO(synk): for decode (grid_m == 1, weight-streaming bound) a deeper weight
    # pipeline (pipeline_mode=pl.Buffered(3) on the weight BlockSpec) can hide DMA
    # latency jitter for a few extra percent.
    if grid_k == 1:
        grid = (grid_m, grid_n)
        in_specs = [
            pl.BlockSpec((tm_eff, d_model), lambda i, j: (i, 0)),   # x rows
            pl.BlockSpec((d_model, tn_eff), lambda i, j: (0, j)),   # weight (K, vocab tile)
            pl.BlockSpec((1, tn_eff), lambda i, j: (0, j)),         # bias tile
        ]
        out_specs = pl.BlockSpec((tm_eff, tn_eff), lambda i, j: (i, j))
        kernel = _linear_kernel_whole_k
        scratch = []
        semantics = ("parallel", "parallel")
    else:
        grid = (grid_m, grid_n, grid_k)
        in_specs = [
            pl.BlockSpec((tm_eff, tk), lambda i, j, k: (i, k)),
            pl.BlockSpec((tk, tn_eff), lambda i, j, k: (k, j)),
            pl.BlockSpec((1, tn_eff), lambda i, j, k: (0, j)),
        ]
        out_specs = pl.BlockSpec((tm_eff, tn_eff), lambda i, j, k: (i, j))
        kernel = _linear_kernel_tiled_k
        scratch = [pltpu.VMEM((tm_eff, tn_eff), jnp.float32)]
        semantics = ("parallel", "parallel", "arbitrary")

    out = pl.pallas_call(
        kernel,
        out_shape=jax.ShapeDtypeStruct((M, vocab), out_dtype),
        grid_spec=pltpu.PrefetchScalarGridSpec(
            num_scalar_prefetch=0,
            grid=grid,
            in_specs=in_specs,
            out_specs=out_specs,
            scratch_shapes=scratch,
        ),
        compiler_params=pltpu.CompilerParams(dimension_semantics=semantics),
        cost_estimate=cost,
    )(x2d, w_t, b2d)

    return out.reshape(*lead_shape, vocab)


# ---------------------------------------------------------------------------
# Self-test
# ---------------------------------------------------------------------------

if __name__ == "__main__":
    batch, seq, d_model, vocab_size = 2, 8, 32, 128

    key = jax.random.PRNGKey(0)
    kx, kw, kb = jax.random.split(key, 3)

    x = jax.random.normal(kx, (batch, seq, d_model), dtype=jnp.float32)

    # nn.Linear-style uniform(-1/sqrt(d_model), +1/sqrt(d_model)) init.
    bound = 1.0 / (d_model ** 0.5)
    weight = jax.random.uniform(kw, (vocab_size, d_model), jnp.float32, -bound, bound)
    bias = jax.random.uniform(kb, (vocab_size,), jnp.float32, -bound, bound)

    # One-time param prep (transpose + cast happen once, not per forward).
    w_t, b2d = prepare_codebook_params(weight, bias)

    y = codebook_reconstruction_forward(x, w_t, b2d)
    y = jax.block_until_ready(y)

    # Reference with the same bf16 input rounding (f32 accumulate).
    x_r = x.astype(jnp.bfloat16).astype(jnp.float32)
    w_r = weight.astype(jnp.bfloat16).astype(jnp.float32)
    y_ref = x_r @ w_r.T + bias
    assert y.shape == (batch, seq, vocab_size)
    assert jnp.allclose(y, y_ref, atol=1e-3, rtol=1e-3), "mismatch vs reference"

    # Ragged-edge path (no padding in the wrapper): non-multiple M and vocab.
    vocab2, seq2 = 136, 5
    w2 = jax.random.uniform(kw, (vocab2, d_model), jnp.float32, -bound, bound)
    b2 = jax.random.uniform(kb, (vocab2,), jnp.float32, -bound, bound)
    x2 = jax.random.normal(kx, (batch, seq2, d_model), dtype=jnp.float32)
    w2_t, b2_2d = prepare_codebook_params(w2, b2)
    y2 = jax.block_until_ready(codebook_reconstruction_forward(x2, w2_t, b2_2d))
    y2_ref = (x2.astype(jnp.bfloat16).astype(jnp.float32)
              @ w2.astype(jnp.bfloat16).astype(jnp.float32).T + b2)
    assert y2.shape == (batch, seq2, vocab2)
    assert jnp.allclose(y2, y2_ref, atol=1e-3, rtol=1e-3), "ragged mismatch vs reference"

    print("KERNEL_OK")
</pallas_src>

<mosaic_0001>
module attributes {stable_mosaic.version = 11 : i64} {
  func.func @_linear_kernel_whole_k(%arg0: i32, %arg1: i32, %arg2: memref<16x32xbf16, #tpu.memory_space<vmem>>, %arg3: memref<32x128xbf16, #tpu.memory_space<vmem>>, %arg4: memref<1x128xf32, #tpu.memory_space<vmem>>, %arg5: memref<16x128xf32, #tpu.memory_space<vmem>>) attributes {dimension_semantics = [#tpu.dimension_semantics<parallel>, #tpu.dimension_semantics<parallel>], iteration_bounds = array<i64: 1, 1>, scalar_prefetch = 0 : i64, scratch_operands = 0 : i64, tpu.core_type = #tpu.core_type<tc>, window_params = [{transform_indices = @transform_0, window_bounds = array<i64: 16, 32>}, {transform_indices = @transform_1, window_bounds = array<i64: 32, 128>}, {transform_indices = @transform_2, window_bounds = array<i64: 1, 128>}, {transform_indices = @transform_3, window_bounds = array<i64: 16, 128>}]} {
    %c0 = arith.constant 0 : index
    %c0_0 = arith.constant 0 : index
    %0 = vector.load %arg2[%c0, %c0_0] : memref<16x32xbf16, #tpu.memory_space<vmem>>, vector<16x32xbf16>
    %c0_1 = arith.constant 0 : index
    %c0_2 = arith.constant 0 : index
    %1 = vector.load %arg3[%c0_1, %c0_2] : memref<32x128xbf16, #tpu.memory_space<vmem>>, vector<32x128xbf16>
    %cst = arith.constant dense<0.000000e+00> : vector<16x128xf32>
    %2 = tpu.matmul %0, %1, %cst {dimension_numbers = #tpu.dot_dimension_numbers<[1], [0], [0], [1], [0, 0, 1, 1], [], []>} : vector<16x32xbf16>, vector<32x128xbf16>, vector<16x128xf32> -> vector<16x128xf32>
    %c0_3 = arith.constant 0 : index
    %c0_4 = arith.constant 0 : index
    %3 = vector.load %arg4[%c0_3, %c0_4] : memref<1x128xf32, #tpu.memory_space<vmem>>, vector<1x128xf32>
    %4 = vector.broadcast %3 : vector<1x128xf32> to vector<16x128xf32>
    %5 = arith.addf %2, %4 : vector<16x128xf32>
    %c0_5 = arith.constant 0 : index
    %c0_6 = arith.constant 0 : index
    %6 = vector.load %arg5[%c0_5, %c0_6] : memref<16x128xf32, #tpu.memory_space<vmem>>, vector<16x128xf32>
    tpu.vector_store %arg5[%c0_5, %c0_6], %5 {strides = array<i32>} : memref<16x128xf32, #tpu.memory_space<vmem>>, vector<16x128xf32>,
    return
  }
  func.func @transform_0(%arg0: i32, %arg1: i32) -> (i32, i32) {
    %c0_i32 = arith.constant 0 : i32
    %c0_i32_0 = arith.constant 0 : i32
    return %arg0, %c0_i32 : i32, i32
  }
  func.func @transform_1(%arg0: i32, %arg1: i32) -> (i32, i32) {
    %c0_i32 = arith.constant 0 : i32
    %c0_i32_0 = arith.constant 0 : i32
    return %c0_i32, %arg1 : i32, i32
  }
  func.func @transform_2(%arg0: i32, %arg1: i32) -> (i32, i32) {
    %c0_i32 = arith.constant 0 : i32
    %c0_i32_0 = arith.constant 0 : i32
    return %c0_i32, %arg1 : i32, i32
  }
  func.func @transform_3(%arg0: i32, %arg1: i32) -> (i32, i32) {
    %c0_i32 = arith.constant 0 : i32
    return %arg0, %arg1 : i32, i32
  }
}

</mosaic_0001>

<bundles_post_ra>
// kernel: tpu_custom_call.1
= control target key start
LH: loop header
LB: loop body
LE: loop exit
PB: predicated region body
PF: predicated region fallthrough
CT: control target
= control target key end

     0   :  { %8 = vsyncpa [#allocation3], 0  ;;  %s307_s0 = inlined_call_operand.hbm [shape: bf16[16,32], index: 0, kind: input, shape index: {}]   ;;  %s308_s1 = inlined_call_operand.hbm [shape: bf16[32,128], index: 1, kind: input, shape index: {}]   ;;  %s309_s2 = inlined_call_operand.vmem [shape: f32[1,128], index: 2, kind: input, shape index: {}]   ;;  %s310_s3 = inlined_call_operand.hbm [shape: f32[16,128], index: 3, kind: output, shape index: {}]  }
   0x1   :  { %9 = vsyncpa [#allocation6], 0 }
   0x2   :  { %10 = vsyncpa [#allocation4], 0  ;;  %s239_s12 = smov [#allocation2]   ;;  %s167_s16 = scalar_lea.hbm %s307_s0, 128 }
   0x3   :  { %s16_s13 = sshll.u32 %s239_s12, 4  ;;  %p168_p0 = scmp.ne.s32.totalorder %s307_s0, %s167_s16  ;;  %s17_s13 = int_to_ptr.vmem [resolvable:$true] %s16_s13 }
   0x4   :  { %p171_p1 = scmp.lt.u32.totalorder %s167_s16, %s307_s0 }
   0x6   :  { %p173_p2 = pnand %p171_p1, %p168_p0 }
   0x8   :  { %176 = shalt.err (!%p173_p2)
}
   0x9   :  { %s177_s21 = scalar_lea.vmem %s17_s13, 128  ;;  %p182_p4 = scmp.lt.s32.totalorder %s17_s13, %s17_s13 }
   0xa   :  { %p178_p3 = scmp.ne.s32.totalorder %s17_s13, %s177_s21  ;;  %p183_p5 = scmp.lt.s32.totalorder %s177_s21, %s177_s21 }
   0xc   :  { %p184_p6 = por %p183_p5, %p182_p4 }
   0xe   :  { %p185_p7 = pnand %p184_p6, %p178_p3 }
  0x10   :  { %188 = shalt.err (!%p185_p7)
}
  0x11   :  { %s240_s22 = smov 64   ;;  %s241_s23 = smov 4  }
  0x12   :  { %22 = dma.hbm_to_vmem [thread:$0]  %s307_s0, 128, %s17_s13, [#allocation3], %s240_s22, %s240_s22, %s241_s23  }
  0x13   :  { %s242_s26 = smov [#allocation5]   ;;  %s189_s30 = scalar_lea.hbm %s308_s1, 256 }
  0x14   :  { %s28_s27 = sshll.u32 %s242_s26, 4  ;;  %p190_p8 = scmp.ne.s32.totalorder %s308_s1, %s189_s30  ;;  %s29_s27 = int_to_ptr.vmem [resolvable:$true] %s28_s27 }
  0x15   :  { %p193_p9 = scmp.lt.u32.totalorder %s189_s30, %s308_s1 }
  0x17   :  { %p195_p10 = pnand %p193_p9, %p190_p8 }
  0x19   :  { %198 = shalt.err (!%p195_p10)
}
  0x1a   :  { %s199_s8 = scalar_lea.vmem %s29_s27, 256  ;;  %p204_p12 = scmp.lt.s32.totalorder %s29_s27, %s29_s27 }
  0x1b   :  { %p200_p11 = scmp.ne.s32.totalorder %s29_s27, %s199_s8  ;;  %p205_p13 = scmp.lt.s32.totalorder %s199_s8, %s199_s8 }
  0x1d   :  { %p206_p0 = por %p205_p13, %p204_p12 }
  0x1f   :  { %p207_p1 = pnand %p206_p0, %p200_p11 }
  0x21   :  { %210 = shalt.err (!%p207_p1)
}
  0x22   :  { %34 = dma.hbm_to_vmem [thread:$0]  %s308_s1, 256, %s29_s27, [#allocation6], %s240_s22, %s240_s22, %s241_s23  }
  0x23   :  { %233 = dma.done.wait [#allocation3], 128  }
  0x24   :  { %234 = vsyncadd [#allocation3], 4294967168 }
  0x25   :  { %235 = dma.done.wait [#allocation6], 256  }
  0x26   :  { %236 = vsyncadd [#allocation6], 4294967040  ;;  %v243_v0 = vmov 0.0   ;;  %vm244_vm0 = vmmov 0   ;;  %v164_v1 = vld [vmem:[#allocation5] sm:$0xff]   ;;  %v165_v2 = vld [vmem:[#allocation5 + $0x8] sm:$0xff]  }
  0x27   :  { %147 = vmatprep.subr.bf16.mxu0 %v243_v0  ;;  %151 = vmatprep.mubr.msk.bf16.mxu0 %vm244_vm0, %v243_v0  ;;  %v166_v3 = vld [vmem:[#allocation2] sm:$0xff]   ;;  %vm74_vm1 = vcmask 261120   ;;  %s245_s1 = smov [#allocation7]  }
  0x28   :  { %148 = vmatpush3.bf16.msra.mxu0 %v164_v1  ;;  %v139_v4 = vld [vmem:[%s309_s2] ss:$0 sm:$0xff]  ;;  %s126_s12 = sshll.u32 %s245_s1, 4  ;;  %s127_s12 = int_to_ptr.vmem [resolvable:$true] %s126_s12 }
  0x29   :  { %149 = vmatprep.subr.bf16.mxu0 %v243_v0  ;;  %s211_s13 = scalar_lea.vmem %s127_s12, 256  ;;  %p216_p3 = scmp.lt.s32.totalorder %s127_s12, %s127_s12 }
  0x2a   :  { %p212_p2 = scmp.ne.s32.totalorder %s127_s12, %s211_s13  ;;  %p217_p4 = scmp.lt.s32.totalorder %s211_s13, %s211_s13 }
  0x2c   :  { %150 = vmatpush3.bf16.msra.mxu0 %v165_v2  ;;  %p218_p5 = por %p217_p4, %p216_p3 }
  0x2e   :  { %p219_p6 = pnand %p218_p5, %p212_p2 }
  0x2f   :  { %152 = vmatmul.mubr.msk.bf16.vlgmr.msra.gmra.mrb[0].mxu0 %vm74_vm1, %v166_v3 }
 0x102   :  { %v112_v5 = vpop.f32.mrb[0].mxu0 }
 0x103   :  { %v113_v6 = vadd.f32 %v139_v4, %v112_v5  ;;  %v153_v7 = vpop.f32.mrb[1].mxu0 }
 0x104   :  { %v115_v8 = vpop.f32.mrb[2].mxu0 }
 0x105   :  { %119 = vst [vmem:[#allocation7] sm:$0xff] %v113_v6  ;;  %v116_v9 = vadd.f32 %v139_v4, %v115_v8  ;;  %v154_v10 = vpop.f32.mrb[3].mxu0 }
 0x107   :  { %120 = vst [vmem:[#allocation7 + $0x8] sm:$0xff] %v116_v9 }
 0x108   :  { %222 = shalt.err (!%p219_p6)
}
 0x109   :  { %s223_s15 = scalar_lea.hbm %s310_s3, 256 }
 0x10a   :  { %p224_p7 = scmp.ne.s32.totalorder %s310_s3, %s223_s15  ;;  %p227_p8 = scmp.lt.u32.totalorder %s223_s15, %s310_s3 }
 0x10c   :  { %p229_p9 = pnand %p227_p8, %p224_p7 }
 0x10e   :  { %232 = shalt.err (!%p229_p9)
}
 0x10f   :  { %s246_s20 = smov 128   ;;  %s247_s21 = smov 8  }
 0x110   :  { %132 = dma.vmem_to_hbm [thread:$0]  %s127_s12, 256, %s310_s3, [#allocation4], %s246_s20, %s246_s20, %s247_s21  }
 0x111   :  { %237 = dma.done.wait [#allocation4], 256  }
 0x112   :  { %238 = vsyncadd [#allocation4], 4294967040 }
 0x113   :  { %136 = vsyncpa [#allocation3], 1 }
 0x114   :  { %137 = vsyncpa [#allocation6], 1 }
 0x115   :  { %138 = vsyncpa [#allocation4], 1 }

</bundles_post_ra>
